<compile_context>
chip_gen: v7x
topology: tpu7x:2x2x1
jax: 0.10.0
libtpu: 0.0.40
codegen_flags: <defaults>
</compile_context>

<pallas_src>
import functools

import jax
import jax.numpy as jnp
from jax.experimental import pallas as pl
from jax.experimental.pallas import tpu as pltpu


# ---------------------------------------------------------------------------
# Kernel
# ---------------------------------------------------------------------------
def _mlp_kernel(x_ref, w1_ref, b1_ref, w2_ref, b2_ref, o_ref, *scratch,
                block_h, resident):
    """One (row-tile, hidden-tile) grid step of relu(x @ W1 + b1) @ W2 + b2."""
    # f32 outputs accumulate in-place in the resident output block; bf16 outputs
    # use the f32 VMEM scratch accumulator.
    acc_ref = scratch[0] if scratch else o_ref
    h = pl.program_id(1)

    @pl.when(h == 0)
    def _init():
        acc_ref[...] = jnp.zeros_like(acc_ref)

    if resident:
        # Full W1/W2/b1 live in VMEM (constant block index -> DMA'd once);
        # slice the current hidden chunk in-kernel (offsets are 128-aligned).
        off = pl.multiple_of(h * block_h, 128)
        w1 = w1_ref[:, pl.ds(off, block_h)]
        b1 = b1_ref[:, pl.ds(off, block_h)]
        w2 = w2_ref[pl.ds(off, block_h), :]
    else:
        w1 = w1_ref[...]
        b1 = b1_ref[...]
        w2 = w2_ref[...]

    # fc1 slice (+ bias) and ReLU, f32 accumulation on the MXU.
    hid = jnp.dot(x_ref[...], w1, preferred_element_type=jnp.float32)
    hid = jnp.maximum(hid + b1.astype(jnp.float32), 0.0)

    # fc2 slice: accumulate this hidden chunk's partial product.
    acc_ref[...] += jnp.dot(hid.astype(w2.dtype), w2,
                            preferred_element_type=jnp.float32)

    @pl.when(h == pl.num_programs(1) - 1)
    def _finalize():
        # Dropout(eval/inference) == identity.
        o_ref[...] = (acc_ref[...] + b2_ref[...].astype(jnp.float32)
                      ).astype(o_ref.dtype)


# ---------------------------------------------------------------------------
# VMEM-aware tile selection
# ---------------------------------------------------------------------------
def _round_up(x, m):
    return ((x + m - 1) // m) * m


@functools.lru_cache(maxsize=None)
def _vmem_capacity_bytes():
    try:
        info = pltpu.get_tpu_info()
        cap = getattr(info, "vmem_capacity_bytes", None)
        if cap:
            return int(cap)
    except Exception:
        pass
    return 64 * 1024 * 1024  # conservative default (v7x per-core VMEM)


def _block_h_for(h128, cap):
    """Largest 128-multiple hidden slice <= cap that divides the padded H."""
    cap = max(128, (cap // 128) * 128)
    if h128 <= cap:
        return h128
    for bh in range(cap, 127, -128):
        if h128 % bh == 0:
            return bh
    return cap  # will pad H up to a multiple of cap


def _m_candidates(start, M):
    start = min(start, _round_up(M, 8))
    cands, v = [], max(start, 8)
    while v >= 8:
        cands.append(v)
        if v == 8:
            break
        v = max(8, ((v // 2) // 8) * 8)
    return cands


def _choose_config(M, E, H, w_itemsize, out_itemsize, budget, allow_resident=True):
    """Pick (block_m, block_h, H_pad, resident) against the VMEM budget."""
    H128 = _round_up(H, 128)

    def footprint(bm, bh, hp, resident):
        x_b = 2 * bm * E * w_itemsize                     # x tile (double-buffered)
        o_b = 2 * bm * E * out_itemsize                   # out tile (double-buffered)
        acc = 0 if out_itemsize == 4 else bm * E * 4      # f32 out accumulates in-place
        hid = bm * bh * 4                                 # fc1 intermediate
        if resident:
            w_b = 2 * (2 * E * hp + hp + E) * w_itemsize  # constant index: fetched once
        else:
            w_b = 2 * (2 * E * bh + bh + E) * w_itemsize + 2 * E * w_itemsize
        return x_b + o_b + acc + hid + w_b

    # Roofline target rows/tile for the streamed-weight regime: each streamed
    # weight byte yields 2*block_m flops -> bf16 wants ~1024 rows, f32 ~512.
    target_m = 1024 if w_itemsize <= 2 else 512
    base_m = min(_round_up(M, 8), target_m)
    # Guarantee >=2 row tiles (megacore sharding) when there is enough work;
    # only used on the resident path where splitting is free.
    split_m = _round_up((M + 1) // 2, 8) if (M >= 256 and M <= base_m) else base_m

    bh0 = _block_h_for(H128, 512)
    hp0 = _round_up(H128, bh0)

    # 1) Weights fully VMEM-resident: DMA'd once, no per-row-tile re-streaming.
    if allow_resident:
        for bm in ([split_m, 256] if split_m > 256 else [split_m]):
            bm = min(bm, _round_up(M, 8))
            if footprint(bm, bh0, hp0, True) <= budget:
                return bm, bh0, hp0, True

    # 2) Streamed weights: largest row tile first (arithmetic intensity on the
    #    re-streamed weights), then the widest hidden slice that fits.
    for bm in _m_candidates(base_m, M):
        for cap in (512, 384, 256, 128):
            bh = _block_h_for(H128, cap)
            hp = _round_up(H128, bh)
            if footprint(bm, bh, hp, False) <= budget:
                return bm, bh, hp, False

    # 3) Last resort: minimal tiles.
    bh = min(H128, 128)
    return min(_round_up(M, 8), 128), bh, _round_up(H128, bh), False


# ---------------------------------------------------------------------------
# Wrapper
# ---------------------------------------------------------------------------
@functools.partial(jax.jit, static_argnames=("block_m", "block_h", "allow_resident"))
def mlp_forward(x, w1, b1, w2, b2, block_m=None, block_h=None, allow_resident=True):
    """MLP forward: Dropout(eval)( relu(x @ W1 + b1) @ W2 + b2 );  x: (B, T, E)."""
    B, T, E = x.shape
    H = w1.shape[1]
    M = B * T
    out_dtype = x.dtype

    w_it = w1.dtype.itemsize
    out_it = jnp.dtype(out_dtype).itemsize

    cap = _vmem_capacity_bytes()
    vmem_limit = int(cap * 0.8)           # scoped VMEM request for this kernel
    budget = int(vmem_limit * 0.85)       # headroom for compiler temporaries

    bm, bh, H_pad, resident = _choose_config(
        M, E, H, w_it, out_it, budget, allow_resident=allow_resident)
    if block_m is not None:
        bm = block_m
    if block_h is not None:
        bh = block_h
        H_pad = _round_up(_round_up(H, 128), bh)

    grid_m = pl.cdiv(M, bm)
    grid_h = H_pad // bh
    grid = (grid_m, grid_h)

    # Flatten rows; cast x to the weight dtype ONCE here (not per hidden step).
    x2 = x.reshape(M, E)
    if x2.dtype != w1.dtype:
        x2 = x2.astype(w1.dtype)

    b1 = b1.reshape(1, H)
    b2 = b2.reshape(1, E)
    if H_pad != H:
        # Zero-padded hidden columns contribute exactly 0 through ReLU @ W2.
        w1 = jnp.pad(w1, ((0, 0), (0, H_pad - H)))
        b1 = jnp.pad(b1, ((0, 0), (0, H_pad - H)))
        w2 = jnp.pad(w2, ((0, H_pad - H), (0, 0)))

    if resident:
        # Constant block index -> each weight is DMA'd from HBM exactly once.
        w1_spec = pl.BlockSpec((E, H_pad), lambda i, h: (0, 0))
        b1_spec = pl.BlockSpec((1, H_pad), lambda i, h: (0, 0))
        w2_spec = pl.BlockSpec((H_pad, E), lambda i, h: (0, 0))
    else:
        # Hidden-dim slices streamed (and pipelined) across the h axis.
        w1_spec = pl.BlockSpec((E, bh), lambda i, h: (0, h))
        b1_spec = pl.BlockSpec((1, bh), lambda i, h: (0, h))
        w2_spec = pl.BlockSpec((bh, E), lambda i, h: (h, 0))

    scratch_shapes = []
    if out_dtype != jnp.float32:
        scratch_shapes.append(pltpu.VMEM((bm, E), jnp.float32))

    flops = 4 * M * E * H_pad  # two matmuls, 2*M*E*H each
    w_bytes = (w1.size + b1.size + w2.size + b2.size) * w_it
    bytes_accessed = int(x2.size * w_it
                         + w_bytes * (1 if resident else grid_m)
                         + M * E * out_it)
    cost = pl.CostEstimate(flops=flops, transcendentals=0,
                           bytes_accessed=bytes_accessed)

    kernel = functools.partial(_mlp_kernel, block_h=bh, resident=resident)

    out2 = pl.pallas_call(
        kernel,
        out_shape=jax.ShapeDtypeStruct((M, E), out_dtype),
        grid_spec=pltpu.PrefetchScalarGridSpec(
            num_scalar_prefetch=0,
            grid=grid,
            in_specs=[
                pl.BlockSpec((bm, E), lambda i, h: (i, 0)),   # x rows (resident over h)
                w1_spec,
                b1_spec,
                w2_spec,
                pl.BlockSpec((1, E), lambda i, h: (0, 0)),    # b2 (tiny, constant)
            ],
            out_specs=pl.BlockSpec((bm, E), lambda i, h: (i, 0)),
            scratch_shapes=scratch_shapes,
        ),
        compiler_params=pltpu.CompilerParams(
            dimension_semantics=("parallel", "arbitrary"),
            vmem_limit_bytes=vmem_limit,
        ),
        cost_estimate=cost,
    )(x2, w1, b1, w2, b2)

    return out2.reshape(B, T, E)


def init_mlp_params(key, n_embed, dtype=jnp.float32):
    """nn.Linear-style init U(-1/sqrt(fan_in), 1/sqrt(fan_in)); weights stored (in, out)."""
    hidden = 4 * n_embed
    k1, k2, k3, k4 = jax.random.split(key, 4)
    bound1 = 1.0 / (n_embed ** 0.5)
    bound2 = 1.0 / (hidden ** 0.5)
    w1 = jax.random.uniform(k1, (n_embed, hidden), dtype, -bound1, bound1)
    b1 = jax.random.uniform(k2, (1, hidden), dtype, -bound1, bound1)
    w2 = jax.random.uniform(k3, (hidden, n_embed), dtype, -bound2, bound2)
    b2 = jax.random.uniform(k4, (1, n_embed), dtype, -bound2, bound2)
    return w1, b1, w2, b2


if __name__ == "__main__":
    key = jax.random.PRNGKey(0)
    kx, kp, kx2, kp2 = jax.random.split(key, 4)

    # --- Test 1: small transformer shapes (f32), resident weights ------------
    B, T, n_embed = 2, 8, 32
    x = jax.random.normal(kx, (B, T, n_embed), dtype=jnp.float32)
    w1, b1, w2, b2 = init_mlp_params(kp, n_embed, dtype=jnp.float32)

    out = mlp_forward(x, w1, b1, w2, b2)
    jax.block_until_ready(out)

    ref = (jnp.maximum(x.reshape(-1, n_embed) @ w1 + b1, 0.0) @ w2 + b2)
    ref = ref.reshape(B, T, n_embed)
    assert out.shape == (B, T, n_embed)
    assert jnp.allclose(out, ref, atol=1e-5, rtol=1e-5)

    # --- Test 2: multiple row tiles + multiple hidden chunks (f32,
    #             resident-weight path, in-place f32 output accumulation) ----
    B2, T2, E2 = 2, 200, 256          # M=400 -> 2 row tiles; H=1024 -> 2 hidden chunks
    x_big = jax.random.normal(kx2, (B2, T2, E2), dtype=jnp.float32)
    w1b, b1b, w2b, b2b = init_mlp_params(kp2, E2, dtype=jnp.float32)

    out_big = mlp_forward(x_big, w1b, b1b, w2b, b2b)
    jax.block_until_ready(out_big)

    ref_big = (jnp.maximum(x_big.reshape(-1, E2) @ w1b + b1b, 0.0) @ w2b + b2b)
    ref_big = ref_big.reshape(B2, T2, E2)
    assert jnp.allclose(out_big, ref_big, atol=2e-2, rtol=2e-2)

    # --- Test 3: same shapes, streamed-weight path (forced), exercising the
    #             hidden-axis weight streaming + partial last row tile --------
    out_stream = mlp_forward(x_big, w1b, b1b, w2b, b2b, allow_resident=False)
    jax.block_until_ready(out_stream)
    assert jnp.allclose(out_stream, ref_big, atol=2e-2, rtol=2e-2)

    # --- Test 4: bf16 weights/activations (fast MXU path), f32 accumulation
    #             in a VMEM scratch, bf16 output ------------------------------
    xb = x.astype(jnp.bfloat16)
    w1h, b1h, w2h, b2h = (p.astype(jnp.bfloat16) for p in (w1, b1, w2, b2))
    out_bf16 = mlp_forward(xb, w1h, b1h, w2h, b2h)
    jax.block_until_ready(out_bf16)
    assert out_bf16.dtype == jnp.bfloat16
    assert jnp.allclose(out_bf16.astype(jnp.float32), ref, atol=5e-2, rtol=5e-2)

    print("KERNEL_OK")
</pallas_src>

<mosaic_0001>
module attributes {stable_mosaic.version = 11 : i64} {
  func.func @_mlp_kernel(%arg0: i32, %arg1: i32, %arg2: memref<16x32xf32, #tpu.memory_space<vmem>>, %arg3: memref<32x128xf32, #tpu.memory_space<vmem>>, %arg4: memref<1x128xf32, #tpu.memory_space<vmem>>, %arg5: memref<128x32xf32, #tpu.memory_space<vmem>>, %arg6: memref<1x32xf32, #tpu.memory_space<vmem>>, %arg7: memref<16x32xf32, #tpu.memory_space<vmem>>) attributes {dimension_semantics = [#tpu.dimension_semantics<parallel>, #tpu.dimension_semantics<arbitrary>], iteration_bounds = array<i64: 1, 1>, scalar_prefetch = 0 : i64, scratch_operands = 0 : i64, tpu.core_type = #tpu.core_type<tc>, window_params = [{transform_indices = @transform_0, window_bounds = array<i64: 16, 32>}, {pipeline_mode = #tpu.pipeline_mode<synchronous>, transform_indices = @transform_1, window_bounds = array<i64: 32, 128>}, {pipeline_mode = #tpu.pipeline_mode<synchronous>, transform_indices = @transform_2, window_bounds = array<i64: 1, 128>}, {pipeline_mode = #tpu.pipeline_mode<synchronous>, transform_indices = @transform_3, window_bounds = array<i64: 128, 32>}, {pipeline_mode = #tpu.pipeline_mode<synchronous>, transform_indices = @transform_4, window_bounds = array<i64: 1, 32>}, {transform_indices = @transform_5, window_bounds = array<i64: 16, 32>}]} {
    %c0_i32 = arith.constant 0 : i32
    %0 = arith.cmpi eq, %arg1, %c0_i32 : i32
    %1 = arith.extui %0 : i1 to i32
    %c0_i32_0 = arith.constant 0 : i32
    %2 = arith.cmpi ne, %1, %c0_i32_0 : i32
    scf.if %2 {
      %cst_13 = arith.constant 0.000000e+00 : f32
      %24 = vector.broadcast %cst_13 : f32 to vector<16x32xf32>
      %c0_14 = arith.constant 0 : index
      %c0_15 = arith.constant 0 : index
      %25 = vector.load %arg7[%c0_14, %c0_15] : memref<16x32xf32, #tpu.memory_space<vmem>>, vector<16x32xf32>
      tpu.vector_store %arg7[%c0_14, %c0_15], %24 {strides = array<i32>} : memref<16x32xf32, #tpu.memory_space<vmem>>, vector<16x32xf32>,
    } else {
    }
    %c128_i32 = arith.constant 128 : i32
    %3 = arith.muli %arg1, %c128_i32 : i32
    %4 = tpu.assume_multiple %3, 128 : i32
    %c0 = arith.constant 0 : index
    %5 = arith.index_cast %4 : i32 to index
    %6 = vector.load %arg3[%c0, %5] : memref<32x128xf32, #tpu.memory_space<vmem>>, vector<32x128xf32>
    %c0_1 = arith.constant 0 : index
    %7 = arith.index_cast %4 : i32 to index
    %8 = vector.load %arg4[%c0_1, %7] : memref<1x128xf32, #tpu.memory_space<vmem>>, vector<1x128xf32>
    %9 = arith.index_cast %4 : i32 to index
    %c0_2 = arith.constant 0 : index
    %10 = vector.load %arg5[%9, %c0_2] : memref<128x32xf32, #tpu.memory_space<vmem>>, vector<128x32xf32>
    %c0_3 = arith.constant 0 : index
    %c0_4 = arith.constant 0 : index
    %11 = vector.load %arg2[%c0_3, %c0_4] : memref<16x32xf32, #tpu.memory_space<vmem>>, vector<16x32xf32>
    %cst = arith.constant dense<0.000000e+00> : vector<16x128xf32>
    %12 = tpu.matmul %11, %6, %cst {dimension_numbers = #tpu.dot_dimension_numbers<[1], [0], [0], [1], [0, 0, 1, 1], [], []>} : vector<16x32xf32>, vector<32x128xf32>, vector<16x128xf32> -> vector<16x128xf32>
    %13 = vector.broadcast %8 : vector<1x128xf32> to vector<16x128xf32>
    %14 = arith.addf %12, %13 : vector<16x128xf32>
    %cst_5 = arith.constant 0.000000e+00 : f32
    %15 = vector.broadcast %cst_5 : f32 to vector<16x128xf32>
    %16 = arith.maximumf %14, %15 : vector<16x128xf32>
    %c0_6 = arith.constant 0 : index
    %c0_7 = arith.constant 0 : index
    %17 = vector.load %arg7[%c0_6, %c0_7] : memref<16x32xf32, #tpu.memory_space<vmem>>, vector<16x32xf32>
    %cst_8 = arith.constant dense<0.000000e+00> : vector<16x32xf32>
    %18 = tpu.matmul %16, %10, %cst_8 {dimension_numbers = #tpu.dot_dimension_numbers<[1], [0], [0], [1], [0, 0, 1, 1], [], []>} : vector<16x128xf32>, vector<128x32xf32>, vector<16x32xf32> -> vector<16x32xf32>
    %19 = arith.addf %17, %18 : vector<16x32xf32>
    %c0_9 = arith.constant 0 : index
    %c0_10 = arith.constant 0 : index
    %20 = vector.load %arg7[%c0_9, %c0_10] : memref<16x32xf32, #tpu.memory_space<vmem>>, vector<16x32xf32>
    tpu.vector_store %arg7[%c0_9, %c0_10], %19 {strides = array<i32>} : memref<16x32xf32, #tpu.memory_space<vmem>>, vector<16x32xf32>,
    %c0_i32_11 = arith.constant 0 : i32
    %21 = arith.cmpi eq, %arg1, %c0_i32_11 : i32
    %22 = arith.extui %21 : i1 to i32
    %c0_i32_12 = arith.constant 0 : i32
    %23 = arith.cmpi ne, %22, %c0_i32_12 : i32
    scf.if %23 {
      %c0_13 = arith.constant 0 : index
      %c0_14 = arith.constant 0 : index
      %24 = vector.load %arg7[%c0_13, %c0_14] : memref<16x32xf32, #tpu.memory_space<vmem>>, vector<16x32xf32>
      %c0_15 = arith.constant 0 : index
      %c0_16 = arith.constant 0 : index
      %25 = vector.load %arg6[%c0_15, %c0_16] : memref<1x32xf32, #tpu.memory_space<vmem>>, vector<1x32xf32>
      %26 = vector.broadcast %25 : vector<1x32xf32> to vector<16x32xf32>
      %27 = arith.addf %24, %26 : vector<16x32xf32>
      %c0_17 = arith.constant 0 : index
      %c0_18 = arith.constant 0 : index
      %28 = vector.load %arg7[%c0_17, %c0_18] : memref<16x32xf32, #tpu.memory_space<vmem>>, vector<16x32xf32>
      tpu.vector_store %arg7[%c0_17, %c0_18], %27 {strides = array<i32>} : memref<16x32xf32, #tpu.memory_space<vmem>>, vector<16x32xf32>,
    } else {
    }
    return
  }
  func.func @transform_0(%arg0: i32, %arg1: i32) -> (i32, i32) {
    %c0_i32 = arith.constant 0 : i32
    %c0_i32_0 = arith.constant 0 : i32
    return %arg0, %c0_i32 : i32, i32
  }
  func.func @transform_1(%arg0: i32, %arg1: i32) -> (i32, i32) {
    %c0_i32 = arith.constant 0 : i32
    %c0_i32_0 = arith.constant 0 : i32
    %c0_i32_1 = arith.constant 0 : i32
    return %c0_i32, %c0_i32_0 : i32, i32
  }
  func.func @transform_2(%arg0: i32, %arg1: i32) -> (i32, i32) {
    %c0_i32 = arith.constant 0 : i32
    %c0_i32_0 = arith.constant 0 : i32
    %c0_i32_1 = arith.constant 0 : i32
    return %c0_i32, %c0_i32_0 : i32, i32
  }
  func.func @transform_3(%arg0: i32, %arg1: i32) -> (i32, i32) {
    %c0_i32 = arith.constant 0 : i32
    %c0_i32_0 = arith.constant 0 : i32
    %c0_i32_1 = arith.constant 0 : i32
    return %c0_i32, %c0_i32_0 : i32, i32
  }
  func.func @transform_4(%arg0: i32, %arg1: i32) -> (i32, i32) {
    %c0_i32 = arith.constant 0 : i32
    %c0_i32_0 = arith.constant 0 : i32
    %c0_i32_1 = arith.constant 0 : i32
    return %c0_i32, %c0_i32_0 : i32, i32
  }
  func.func @transform_5(%arg0: i32, %arg1: i32) -> (i32, i32) {
    %c0_i32 = arith.constant 0 : i32
    %c0_i32_0 = arith.constant 0 : i32
    return %arg0, %c0_i32 : i32, i32
  }
}

</mosaic_0001>

<bundles_post_ra>
// kernel: mlp_forward.1
= control target key start
LH: loop header
LB: loop body
LE: loop exit
PB: predicated region body
PF: predicated region fallthrough
CT: control target
= control target key end

     0   :  { %vm25_vm0 = vcmask 261120   ;;  %s530_s0 = inlined_call_operand.vmem [shape: f32[16,32], index: 0, kind: input, shape index: {}]   ;;  %s531_s1 = inlined_call_operand.vmem [shape: f32[32,128], index: 1, kind: input, shape index: {}]   ;;  %s532_s2 = inlined_call_operand.vmem [shape: f32[1,128], index: 2, kind: input, shape index: {}]   ;;  %s533_s3 = inlined_call_operand.vmem [shape: f32[128,32], index: 3, kind: input, shape index: {}]   ;;  %s534_s4 = inlined_call_operand.vmem [shape: f32[1,32], index: 4, kind: input, shape index: {}]   ;;  %s535_s5 = inlined_call_operand.hbm [shape: f32[16,32], index: 5, kind: output, shape index: {}]  }
   0x1   :  { %v32_v0 = vld [vmem:[%s531_s1] sm:$0xff]  ;;  %v33_v1 = vld [vmem:[%s531_s1 + $0x8] sm:$0xff]  ;;  %v34_v2 = vld [vmem:[%s531_s1 + $0x10] sm:$0xff] }
   0x2   :  { %v336_v3 = vpack.c.bf16 %v33_v1, %v32_v0  ;;  %v35_v4 = vld [vmem:[%s531_s1 + $0x18] sm:$0xff]  ;;  %v55_v5 = vld [vmem:[%s530_s0] sm:$0xff]  ;;  %v40_v8 = vld [vmem:[%s533_s3 + $0x8] sm:$0xff] }
   0x3   :  { %v340_v6 = vpack.c.bf16 %v35_v4, %v34_v2  ;;  %298 = vmatprep.mubr.msk.f32.mxu0 %vm25_vm0, %v55_v5  ;;  %v39_v7 = vld [vmem:[%s533_s3] sm:$0xff]  ;;  %v41_v9 = vld [vmem:[%s533_s3 + $0x10] sm:$0xff]  ;;  %v42_v11 = vld [vmem:[%s533_s3 + $0x18] sm:$0xff] }
   0x4   :  { %337 = vmatprep.subr.bf16.mxu0 %v336_v3  ;;  %v344_v10 = vpack.c.bf16 %v40_v8, %v39_v7  ;;  %v348_v12 = vpack.c.bf16 %v42_v11, %v41_v9  ;;  %v43_v13 = vld [vmem:[%s533_s3 + $0x20] sm:$0xff]  ;;  %v44_v14 = vld [vmem:[%s533_s3 + $0x28] sm:$0xff] }
   0x5   :  { %339 = vmatpush3.bf16.msra.mxu0 %v336_v3 }
   0x6   :  { %341 = vmatprep.subr.bf16.mxu0 %v340_v6  ;;  %345 = vmatprep.subr.bf16.mxu1 %v344_v10 }
   0x7   :  { %347 = vmatpush3.bf16.msra.mxu1 %v344_v10 }
   0x8   :  { %10 = vsyncpa [#allocation3], 0  ;;  %349 = vmatprep.subr.bf16.mxu1 %v348_v12  ;;  %v352_v15 = vpack.c.bf16 %v44_v14, %v43_v13  ;;  %v56_v16 = vld [vmem:[%s530_s0 + $0x8] sm:$0xff]  ;;  %v45_v17 = vld [vmem:[%s533_s3 + $0x30] sm:$0xff]  ;;  %v404_v32 = vmov 0.0   ;;  %s405_s11 = smov [#allocation2]  }
   0x9   :  { %343 = vmatpush3.bf16.msra.mxu0 %v340_v6  ;;  %v46_v18 = vld [vmem:[%s533_s3 + $0x38] sm:$0xff]  ;;  %v47_v20 = vld [vmem:[%s533_s3 + $0x40] sm:$0xff]  ;;  %v48_v21 = vld [vmem:[%s533_s3 + $0x48] sm:$0xff]  ;;  %27 = vst.msk [vmem:[#allocation2 + $0x8] sm:$0xff] %vm25_vm0, %v404_v32  ;;  %s249_s12 = sshll.u32 %s405_s11, 4  ;;  %s250_s12 = int_to_ptr.vmem [resolvable:$true] %s249_s12 }
   0xa   :  { %v356_v19 = vpack.c.bf16 %v46_v18, %v45_v17  ;;  %v360_v22 = vpack.c.bf16 %v48_v21, %v47_v20  ;;  %v49_v23 = vld [vmem:[%s533_s3 + $0x50] sm:$0xff]  ;;  %v50_v24 = vld [vmem:[%s533_s3 + $0x58] sm:$0xff]  ;;  %v51_v26 = vld [vmem:[%s533_s3 + $0x60] sm:$0xff]  ;;  %26 = vst.msk [vmem:[#allocation2] sm:$0xff] %vm25_vm0, %v404_v32  ;;  %s380_s13 = scalar_lea.vmem %s250_s12, 256  ;;  %p385_p1 = scmp.lt.s32.totalorder %s250_s12, %s250_s12 }
   0xb   :  { %351 = vmatpush3.bf16.msra.mxu1 %v348_v12  ;;  %v364_v25 = vpack.c.bf16 %v50_v24, %v49_v23  ;;  %v52_v27 = vld [vmem:[%s533_s3 + $0x68] sm:$0xff]  ;;  %v53_v29 = vld [vmem:[%s533_s3 + $0x70] sm:$0xff]  ;;  %v54_v30 = vld [vmem:[%s533_s3 + $0x78] sm:$0xff]  ;;  %p381_p0 = scmp.ne.s32.totalorder %s250_s12, %s380_s13  ;;  %p386_p2 = scmp.lt.s32.totalorder %s380_s13, %s380_s13 }
   0xc   :  { %299 = vmatmul.mubr.msk.f32.vlgmr.msra.gmra.mrb[0].mxu0 %vm25_vm0, %v56_v16  ;;  %353 = vmatprep.subr.bf16.mxu1 %v352_v15  ;;  %v368_v28 = vpack.c.bf16 %v52_v27, %v51_v26  ;;  %v372_v31 = vpack.c.bf16 %v54_v30, %v53_v29  ;;  %v262_v33 = vld [vmem:[%s532_s2] ss:$0 sm:$0xff] }
   0xd   :  { %v265_v46 = vld [vmem:[%s534_s4] ss:$0 sm:$0xff]  ;;  %p387_p3 = por %p386_p2, %p385_p1 }
   0xf   :  { %355 = vmatpush3.bf16.msra.mxu1 %v352_v15  ;;  %p388_p4 = pnand %p387_p3, %p381_p0 }
  0x10   :  { %357 = vmatprep.subr.bf16.mxu1 %v356_v19  ;;  %v148_v40 = vld [vmem:[#allocation2 + $0x8] sm:$0xff] }
  0x11   :  { %v147_v41 = vld [vmem:[#allocation2] sm:$0xff] }
  0x13   :  { %359 = vmatpush3.bf16.msra.mxu1 %v356_v19 }
  0x14   :  { %361 = vmatprep.subr.bf16.mxu1 %v360_v22 }
  0x17   :  { %363 = vmatpush3.bf16.msra.mxu1 %v360_v22 }
  0x18   :  { %365 = vmatprep.subr.bf16.mxu1 %v364_v25 }
  0x1b   :  { %367 = vmatpush3.bf16.msra.mxu1 %v364_v25 }
  0x1c   :  { %369 = vmatprep.subr.bf16.mxu1 %v368_v28 }
  0x1f   :  { %371 = vmatpush3.bf16.msra.mxu1 %v368_v28 }
  0x20   :  { %373 = vmatprep.subr.bf16.mxu1 %v372_v31 }
  0x23   :  { %375 = vmatpush3.bf16.msra.mxu1 %v372_v31 }
  0xdf   :  { %v300_v34 = vpop.f32.mrb[0].mxu0 }
  0xe0   :  { %v142_v35 = vadd.f32 %v300_v34, %v262_v33  ;;  %v136_v36 = vpop.f32.mrb[1].mxu0 }
  0xe1   :  { %v137_v37 = vadd.f32 %v262_v33, %v136_v36 }
  0xe2   :  { %v146_v39 = vmax.f32 %v142_v35, 0.0 }
  0xe3   :  { %v145_v38 = vmax.f32 %v137_v37, 0.0 }
  0xe5   :  { %333 = vmatprep.mubr.f32.mxu1 %v145_v38 }
  0xe6   :  { %334 = vmatmul.mubr.f32.vlgmr.msra.gmra.mrb[0].mxu1 %v146_v39 }
 0x1b9   :  { %v335_v42 = vpop.f32.mrb[0].mxu1 }
 0x1ba   :  { %v225_v43 = vadd.f32 %v335_v42, %v148_v40  ;;  %v215_v44 = vpop.f32.mrb[1].mxu1 }
 0x1bb   :  { %v224_v45 = vadd.f32 %v215_v44, %v147_v41 }
 0x1bc   :  { %227 = vst.msk [vmem:[#allocation2 + $0x8] sm:$0xff] %vm25_vm0, %v225_v43 }
 0x1bd   :  { %226 = vst.msk [vmem:[#allocation2] sm:$0xff] %vm25_vm0, %v224_v45 }
 0x1c3   :  { %v232_v47 = vld [vmem:[#allocation2 + $0x8] sm:$0xff] }
 0x1c4   :  { %v231_v48 = vld [vmem:[#allocation2] sm:$0xff]  ;;  %v241_v49 = vadd.f32 %v265_v46, %v232_v47 }
 0x1c5   :  { %v240_v50 = vadd.f32 %v265_v46, %v231_v48 }
 0x1c6   :  { %243 = vst.msk [vmem:[#allocation2 + $0x8] sm:$0xff] %vm25_vm0, %v241_v49 }
 0x1c7   :  { %242 = vst.msk [vmem:[#allocation2] sm:$0xff] %vm25_vm0, %v240_v50 }
 0x1c8   :  { %391 = shalt.err (!%p388_p4)
}
 0x1c9   :  { %s392_s15 = scalar_lea.hbm %s535_s5, 256 }
 0x1ca   :  { %p393_p5 = scmp.ne.s32.totalorder %s535_s5, %s392_s15  ;;  %p396_p6 = scmp.lt.u32.totalorder %s392_s15, %s535_s5 }
 0x1cc   :  { %p398_p7 = pnand %p396_p6, %p393_p5 }
 0x1ce   :  { %401 = shalt.err (!%p398_p7)
}
 0x1cf   :  { %s406_s20 = smov 128   ;;  %s407_s21 = smov 8  }
 0x1d0   :  { %255 = dma.vmem_to_hbm [thread:$0]  %s250_s12, 256, %s535_s5, [#allocation3], %s406_s20, %s406_s20, %s407_s21  }
 0x1d1   :  { %402 = dma.done.wait [#allocation3], 256  }
 0x1d2   :  { %403 = vsyncadd [#allocation3], 4294967040 }
 0x1d3   :  { %259 = vsyncpa [#allocation3], 1 }

</bundles_post_ra>
